<compile_context>
chip_gen: v7x
topology: tpu7x:2x2x1
jax: 0.10.0
libtpu: 0.0.40
codegen_flags: <defaults>
</compile_context>

<pallas_src>
import functools

import jax
import jax.numpy as jnp
import numpy as np
from jax import lax
from jax.experimental import pallas as pl
from jax.experimental.pallas import tpu as pltpu


def _moving_avg_kernel(a_ref, x_ref, out_ref, *, precision):
    """One (batch-tile, channel-tile) block.

    a_ref  : (L_out, L)       constant averaging matrix (VMEM-resident)
    x_ref  : (bt, L, ct)      input tile
    out_ref: (bt, L_out, ct)  output tile
    """
    a = a_ref[...]
    for bi in range(x_ref.shape[0]):  # small static unroll; one 2-D MXU matmul each
        out_ref[bi, :, :] = jnp.dot(
            a,
            x_ref[bi, :, :],
            precision=precision,
            preferred_element_type=jnp.float32,
        ).astype(out_ref.dtype)


def _build_avg_matrix(l, kernel_size, stride, pad, l_out):
    """(L_out, L) banded matrix: row t holds weight 1/k for every padded index in
    window t; replicate-padding weights are folded onto columns 0 / L-1."""
    starts = np.arange(l_out) * stride
    j = starts[:, None] + np.arange(kernel_size)[None, :]   # indices in padded seq
    src = np.clip(j - pad, 0, l - 1)                        # replicate edges
    a = np.zeros((l_out, l), dtype=np.float64)
    np.add.at(a, (np.repeat(np.arange(l_out), kernel_size), src.reshape(-1)), 1.0)
    a /= kernel_size
    return a


@functools.lru_cache(maxsize=None)
def _vmem_budget_and_limit():
    """Generation-aware (per-step tile budget, scoped-VMEM limit) in bytes."""
    try:
        phys = int(pltpu.get_tpu_info().vmem_capacity_bytes)
    except Exception:  # conservative fallback: v7x per-TensorCore size
        phys = 64 * 1024 * 1024
    budget = max(min(phys // 4, 24 * 1024 * 1024), 6 * 1024 * 1024)
    limit = min(phys - 8 * 1024 * 1024, 2 * budget + 8 * 1024 * 1024)
    return budget, limit


def _choose_tiles(b, c, l, l_out, itemsize, budget):
    """Pick (batch_tile, channel_tile): lane-dense ct, batch grouping to amortize
    per-grid-step overhead, and >=2 grid steps when possible (v7x megacore)."""
    per_lane = 2 * (l + l_out) * itemsize  # double-buffered in + out, one batch row
    candidates = [t for t in (1024, 512, 256, 128) if c % t == 0]
    if candidates:
        ct = next((t for t in candidates if t * per_lane <= budget), candidates[-1])
    else:
        ct = c  # small / odd C: take the full channel dim (full-extent block)

    def step_bytes(bt_):
        return bt_ * ct * (l + l_out) * itemsize

    bt = 1
    while (
        bt * 2 <= min(b, 8)
        and b % (bt * 2) == 0
        and 2 * step_bytes(bt * 2) <= budget
        and step_bytes(bt) < (512 * 1024)
        and (b // (bt * 2)) * (c // ct) >= 2
    ):
        bt *= 2

    # Keep both v7x TensorCores busy: avoid a degenerate (1, 1) grid when the
    # channel tile can be split while staying lane-dense.
    if (b // bt) * (c // ct) < 2 and ct % 256 == 0:
        ct //= 2
    return bt, ct


def moving_avg(x, kernel_size, stride):
    """JAX/Pallas equivalent of moving_avg.forward.

    x: (B, L, C) -> (B, L_out, C) with
    L_out = (L + 2*((kernel_size-1)//2) - kernel_size)//stride + 1,
    matching replicate padding of (kernel_size-1)//2 on both ends + AvgPool1d.
    """
    if kernel_size < 1 or stride < 1:
        raise ValueError("kernel_size and stride must be >= 1")
    b, l, c = x.shape
    pad = (kernel_size - 1) // 2
    l_pad = l + 2 * pad
    l_out = (l_pad - kernel_size) // stride + 1
    if l_out < 1:
        raise ValueError(
            f"kernel_size={kernel_size} too large for sequence length {l} "
            f"(padded length {l_pad})"
        )

    if x.dtype == jnp.float32:
        # f32 contract on the MXU keeps ~1e-7 parity with the f32 reference.
        a_dtype, precision = jnp.float32, lax.Precision.HIGHEST
    else:
        a_dtype, precision = x.dtype, lax.Precision.DEFAULT

    a_mat = jnp.asarray(
        _build_avg_matrix(l, kernel_size, stride, pad, l_out), dtype=a_dtype
    )

    itemsize = jnp.dtype(x.dtype).itemsize
    budget, vmem_limit = _vmem_budget_and_limit()
    bt, ct = _choose_tiles(b, c, l, l_out, itemsize, budget)

    kernel = functools.partial(_moving_avg_kernel, precision=precision)

    bytes_accessed = (b * l * c + b * l_out * c) * itemsize + int(
        a_mat.size * a_mat.dtype.itemsize
    )
    cost = pl.CostEstimate(
        flops=2 * b * l_out * l * c,
        transcendentals=0,
        bytes_accessed=int(bytes_accessed),
    )

    return pl.pallas_call(
        kernel,
        out_shape=jax.ShapeDtypeStruct((b, l_out, c), x.dtype),
        grid=(b // bt, c // ct),
        in_specs=[
            # Constant averaging matrix: same block for every step -> VMEM-resident.
            pl.BlockSpec((l_out, l), lambda bi, ci: (0, 0)),
            # Batch-tile x full time axis x lane-dense channel tile.
            pl.BlockSpec((bt, l, ct), lambda bi, ci: (bi, 0, ci)),
        ],
        out_specs=pl.BlockSpec((bt, l_out, ct), lambda bi, ci: (bi, 0, ci)),
        compiler_params=pltpu.CompilerParams(
            dimension_semantics=("parallel", "parallel"),
            vmem_limit_bytes=int(vmem_limit),
        ),
        cost_estimate=cost,
    )(a_mat, x)


def _reference_moving_avg(x, kernel_size, stride):
    """Pure-JAX reference matching the PyTorch forward exactly."""
    pad = (kernel_size - 1) // 2
    front = jnp.repeat(x[:, 0:1, :], pad, axis=1)
    end = jnp.repeat(x[:, -1:, :], pad, axis=1)
    xpad = jnp.concatenate([front, x, end], axis=1)
    l_pad = xpad.shape[1]
    l_out = (l_pad - kernel_size) // stride + 1
    windows = jnp.stack(
        [xpad[:, t * stride: t * stride + kernel_size, :] for t in range(l_out)],
        axis=1,
    )  # (B, L_out, k, C)
    return jnp.mean(windows, axis=2)


if __name__ == "__main__":
    key = jax.random.PRNGKey(0)

    cases = [
        # (B, L, C, kernel_size, stride)
        (2, 8, 32, 5, 1),      # small shape consistent with the module
        (2, 96, 256, 25, 1),   # Autoformer-style window, lane-dense channels
        (2, 24, 128, 4, 2),    # even kernel + stride>1 (stride folded into A rows)
    ]

    for (B, L, C, k, s) in cases:
        key, sub = jax.random.split(key)
        x = jax.random.normal(sub, (B, L, C), dtype=jnp.float32)

        out = jax.block_until_ready(moving_avg(x, k, s))
        ref = _reference_moving_avg(x, k, s)

        assert out.shape == ref.shape, (out.shape, ref.shape)
        assert jnp.allclose(out, ref, atol=1e-5, rtol=1e-5), (
            f"mismatch vs reference for case B={B} L={L} C={C} k={k} s={s}"
        )

    print("KERNEL_OK")
</pallas_src>

<mosaic_0001>
module attributes {stable_mosaic.version = 11 : i64} {
  func.func @_moving_avg_kernel(%arg0: i32, %arg1: i32, %arg2: memref<8x8xf32, #tpu.memory_space<vmem>>, %arg3: memref<1x8x32xf32, #tpu.memory_space<vmem>>, %arg4: memref<1x8x32xf32, #tpu.memory_space<vmem>>) attributes {dimension_semantics = [#tpu.dimension_semantics<parallel>, #tpu.dimension_semantics<parallel>], iteration_bounds = array<i64: 2, 1>, scalar_prefetch = 0 : i64, scratch_operands = 0 : i64, tpu.core_type = #tpu.core_type<tc>, window_params = [{pipeline_mode = #tpu.pipeline_mode<synchronous>, transform_indices = @transform_0, window_bounds = array<i64: 8, 8>}, {transform_indices = @transform_1, window_bounds = array<i64: 1, 8, 32>}, {transform_indices = @transform_2, window_bounds = array<i64: 1, 8, 32>}]} {
    %c0 = arith.constant 0 : index
    %c0_0 = arith.constant 0 : index
    %0 = vector.load %arg2[%c0, %c0_0] : memref<8x8xf32, #tpu.memory_space<vmem>>, vector<8x8xf32>
    %c0_1 = arith.constant 0 : index
    %c0_2 = arith.constant 0 : index
    %c0_3 = arith.constant 0 : index
    %1 = vector.load %arg3[%c0_1, %c0_2, %c0_3] : memref<1x8x32xf32, #tpu.memory_space<vmem>>, vector<1x8x32xf32>
    %2 = vector.shape_cast %1 : vector<1x8x32xf32> to vector<8x32xf32>
    %cst = arith.constant dense<0.000000e+00> : vector<8x32xf32>
    %3 = tpu.matmul %0, %2, %cst {dimension_numbers = #tpu.dot_dimension_numbers<[1], [0], [0], [1], [0, 0, 1, 1], [], []>, precision = #tpu.contract_precision<fp32>} : vector<8x8xf32>, vector<8x32xf32>, vector<8x32xf32> -> vector<8x32xf32>
    %c0_4 = arith.constant 0 : index
    %c0_5 = arith.constant 0 : index
    %c0_6 = arith.constant 0 : index
    %4 = vector.load %arg4[%c0_4, %c0_5, %c0_6] : memref<1x8x32xf32, #tpu.memory_space<vmem>>, vector<1x8x32xf32>
    %5 = vector.shape_cast %4 : vector<1x8x32xf32> to vector<8x32xf32>
    %6 = vector.shape_cast %3 : vector<8x32xf32> to vector<1x8x32xf32>
    tpu.vector_store %arg4[%c0_4, %c0_5, %c0_6], %6 {strides = array<i32>} : memref<1x8x32xf32, #tpu.memory_space<vmem>>, vector<1x8x32xf32>,
    return
  }
  func.func @transform_0(%arg0: i32, %arg1: i32) -> (i32, i32) {
    %c0_i32 = arith.constant 0 : i32
    %c0_i32_0 = arith.constant 0 : i32
    %c0_i32_1 = arith.constant 0 : i32
    return %c0_i32, %c0_i32_0 : i32, i32
  }
  func.func @transform_1(%arg0: i32, %arg1: i32) -> (i32, i32, i32) {
    %c0_i32 = arith.constant 0 : i32
    %c0_i32_0 = arith.constant 0 : i32
    return %arg0, %c0_i32, %arg1 : i32, i32, i32
  }
  func.func @transform_2(%arg0: i32, %arg1: i32) -> (i32, i32, i32) {
    %c0_i32 = arith.constant 0 : i32
    %c0_i32_0 = arith.constant 0 : i32
    return %arg0, %c0_i32, %arg1 : i32, i32, i32
  }
}

</mosaic_0001>

<bundles_post_ra>
// kernel: tpu_custom_call.1
= control target key start
LH: loop header
LB: loop body
LE: loop exit
PB: predicated region body
PF: predicated region fallthrough
CT: control target
= control target key end

     0   :  { %7 = vsyncpa [#allocation3], 0  ;;  %s1283_s0 = inlined_call_operand.hbm [shape: f32[8,8], index: 0, kind: input, shape index: {}]   ;;  %s1284_s1 = inlined_call_operand.hbm [shape: f32[2,8,32], index: 1, kind: input, shape index: {}]   ;;  %s1285_s2 = inlined_call_operand.hbm [shape: f32[2,8,32], index: 2, kind: output, shape index: {}]  }
   0x1   :  { %8 = vsyncpa [#allocation6], 0 }
   0x2   :  { %10 = vsyncpa [#allocation6 + $0x1], 0 }
   0x3   :  { %11 = vsyncpa [#allocation4], 0 }
   0x4   :  { %13 = vsyncpa [#allocation4 + $0x1], 0  ;;  %s1057_s9 = smov 0   ;;  %s1059_s10 = smov 0  }
   0x5   :  { %s1061_s11 = smov 0   ;;  %s1063_s12 = smov 0  }
   0x6   :  { %s1065_s13 = smov 0   ;;  %s1067_s14 = smov 0  }
   0x7 LB: > { %s750_s15 = sadd.s32 4294967295, %s1035_s14   ;;  %s751_s16 = sadd.s32 4294967294, %s1035_s14   ;;  %s1035_s14 = sphi %s1067_s14, %s19_s14   ;;  %s1031_s13 = sphi %s1065_s13, %s1310_s13   ;;  %s1027_s12 = sphi %s1063_s12, %s1309_s12   ;;  %s1023_s11 = sphi %s1061_s11, %s1308_s11   ;;  %s1019_s10 = sphi %s1059_s10, %s1307_s10   ;;  %s1015_s9 = sphi %s1057_s9, %s1306_s9  }
   0x8   : > { %p74_p0 = scmp.ne.s32.totalorder %s1019_s10, %s1015_s9  ;;  %p1091_p1 = scmp.eq.s32.totalorder %s750_s15, 0 }
   0x9   : > { %p1095_p2 = scmp.eq.s32.totalorder %s750_s15, 1  ;;  %p106_p3 = scmp.eq.s32.totalorder %s751_s16, 1 }
   0xa   : > { %s1290_s17 = scalar_select %p1091_p1, 1, 0 }
   0xb   : > { %s1291_s18 = scalar_select %p1095_p2, 1, 0 }
   0xc   : > { %p1101_p4 = por %p1091_p1, %p74_p0  ;;  %p752_p5 = scmp.ge.s32.totalorder %s1035_s14, 1 }
   0xd   : > { %p1106_p6 = por %p106_p3, %p74_p0  ;;  %p113_p7 = scmp.lt.s32.totalorder %s1035_s14, 3 }
   0xe   : > { %s1292_s19 = scalar_select %p1101_p4, 1, 0 }
   0xf   : > { %s1293_s20 = scalar_select %p1106_p6, 1, 0 }
  0x10   : > { %p1111_p8 = pnand %p752_p5, %p113_p7  ;;  %s1037_s22 = smov [#allocation2]  }
  0x11   : > { %s126_s23 = sshll.u32 %s1037_s22, 4  ;;  %s31_s25 = sadd.s32 1, %s1031_s13  ;;  %s127_s23 = int_to_ptr.vmem [resolvable:$true] %s126_s23 }
  0x12   : > { %s1294_s21 = scalar_select %p1111_p8, 1, 0 }
  0x13   : > { %p824_p10 = pneg %p1111_p8  ;;  %s61_s26 = sadd.s32 1, %s1023_s11 }
  0x14   : > { %p1126_p12 = scmp.ge.s32.totalorder %s31_s25, 2  ;;  %s891_s30 = scalar_lea.hbm %s1283_s0, 128 }
  0x15   : > { %p1120_p11 = pnand %p824_p10, %p1091_p1  ;;  %p892_p13 = scmp.ne.s32.totalorder %s1283_s0, %s891_s30 }
  0x16   : > { %s1296_s27 = scalar_select %p1126_p12, 1, 0 }
  0x17   : > { %p893_p0 = pneg %p1120_p11  ;;  %p898_p7 = scmp.lt.u32.totalorder %s891_s30, %s1283_s0 }
  0x19   : > { %p894_p3 = pnand %p893_p0, %p892_p13 }
  0x1b   : > { %p895_p5 = pneg %p894_p3 }
  0x1d   : > { %p900_p10 = pnand %p898_p7, %p895_p5 }
  0x1f   : > { %903 = shalt.err (!%p900_p10)
}
  0x20   : > { %s904_s7 = scalar_lea.vmem %s127_s23, 128  ;;  %p912_p1 = scmp.lt.s32.totalorder %s127_s23, %s127_s23 }
  0x21   : > { %p905_p9 = scmp.ne.s32.totalorder %s127_s23, %s904_s7  ;;  %p913_p8 = scmp.lt.s32.totalorder %s904_s7, %s904_s7 }
  0x23   : > { %p907_p6 = pnand %p905_p9, %p893_p0  ;;  %p914_p2 = por %p913_p8, %p912_p1 }
  0x25   : > { %p908_p4 = pneg %p907_p6 }
  0x27   : > { %p915_p12 = pnand %p914_p2, %p908_p4 }
  0x29   : > { %918 = shalt.err (!%p915_p12)
}
  0x2a   : > { %827 = dma.hbm_to_vmem [thread:$0]  (!%p1120_p11), %s1283_s0, 128, %s127_s23, [#allocation3]  }
  0x2b   : > { %p1297_p1 = scmp.ne.s32.totalorder %s1296_s27, 0  ;;  %p68_p2 = scmp.ne.s32.totalorder %s1023_s11, %s1019_s10 }
  0x2c   : > { %p69_p4 = scmp.eq.s32.totalorder %s1035_s14, 0  ;;  %p837_p6 = scmp.lt.s32.totalorder %s1035_s14, 2 }
  0x2d   : > { %s1312_s25 = smov (%p1297_p1, %s31_s25), 0  ;;  %p1298_p12 = scmp.ne.s32.totalorder %s1291_s18, 0 }
  0x2e   : > { %s56_s16 = ssub.s32 %s1031_s13, %s1312_s25  ;;  %p70_p9 = por %p69_p4, %p68_p2 }
  0x2f   : > { %p59_p8 = scmp.eq.s32.totalorder %s56_s16, 0  ;;  %p1158_p13 = por %p1298_p12, %p68_p2 }
  0x30   : > { %s137_s24 = sand.u32 1, %s1023_s11   ;;  %s756_s27 = sshll.u32 %s1031_s13, 7 }
  0x31   : > { %s1166_s28 = scalar_select %p59_p8, %s1023_s11, %s61_s26  }
  0x32   : > { %s755_s23 = sshll.u32 %s137_s24, 3  ;;  %s1172_s3 = scalar_lea.hbm %s1284_s1, %s756_s27 }
  0x33   : > { %s141_s18 = scalar_lea.vmem [#allocation5], %s755_s23  ;;  %p1176_p11 = pnand %p837_p6, %p70_p9 }
  0x34   : > { %s149_s4 = sshll.u32 %s141_s18, 4  ;;  %s138_s26 = scalar_lea.sflag [#allocation6], %s137_s24  ;;  %s1174_s4 = int_to_ptr.vmem [resolvable:$true] %s149_s4 }
  0x35   : > { %s919_s6 = scalar_lea.hbm %s1172_s3, 128  ;;  %p921_p3 = pneg %p1176_p11 }
  0x36   : > { %p920_p0 = scmp.ne.s32.totalorder %s1172_s3, %s919_s6  ;;  %s924_s15 = scalar_lea.hbm %s1284_s1, 256 }
  0x37   : > { %p925_p10 = scmp.lt.u32.totalorder %s1172_s3, %s1284_s1  ;;  %p926_p1 = scmp.lt.u32.totalorder %s924_s15, %s919_s6 }
  0x38   : > { %p922_p5 = pnand %p921_p3, %p920_p0  ;;  %p928_p4 = scmp.lt.u32.totalorder %s919_s6, %s1172_s3 }
  0x39   : > { %p927_p2 = por %p926_p1, %p925_p10 }
  0x3a   : > { %p923_p7 = pneg %p922_p5 }
  0x3b   : > { %p929_p6 = por %p928_p4, %p927_p2 }
  0x3d   : > { %p930_p8 = pnand %p929_p6, %p923_p7 }
  0x3f   : > { %933 = shalt.err (!%p930_p8)
}
  0x40   : > { %s934_s24 = scalar_lea.vmem %s1174_s4, 128  ;;  %s1038_s27 = smov [#allocation5]  }
  0x41   : > { %p935_p9 = scmp.ne.s32.totalorder %s1174_s4, %s934_s24  ;;  %s939_s29 = sshll.u32 %s1038_s27, 4  ;;  %s940_s29 = int_to_ptr.vmem [resolvable:$false] %s939_s29 }
  0x42   : > { %s941_s30 = scalar_lea.vmem %s940_s29, 256  ;;  %p942_p5 = scmp.lt.s32.totalorder %s1174_s4, %s940_s29 }
  0x43   : > { %p937_p12 = pnand %p935_p9, %p921_p3  ;;  %p943_p10 = scmp.lt.s32.totalorder %s941_s30, %s934_s24 }
  0x45   : > { %p938_p0 = pneg %p937_p12  ;;  %p944_p1 = por %p943_p10, %p942_p5 }
  0x47   : > { %p945_p2 = pnand %p944_p1, %p938_p0 }
  0x49   : > { %948 = shalt.err (!%p945_p2)
}
  0x4a   : > { %831 = dma.hbm_to_vmem [thread:$0]  (!%p1176_p11), %s1172_s3, 128, %s1174_s4, %s138_s26  }
  0x4b   : > { %p1301_p7 = scmp.ne.s32.totalorder %s1294_s21, 0 }
  0x4c   : > { %p1302_p3 = scmp.ne.s32.totalorder (!%p1301_p7), %s1290_s17, 0 }
  0x4d   : > { %158 = sbr.rel (%p1301_p7) target bundleno = 345 (0x159), region = 28 }
  0x54   : > { %1002 = dma.done.wait (%p1302_p3), [#allocation3], 128  }
  0x55   : > { %1004 = vsyncadd (%p1302_p3), [#allocation3], 4294967168  ;;  %s1212_s18 = sand.u32 1, %s1019_s10   ;;  %p1303_p11 = scmp.ne.s32.totalorder %s1292_s19, 0 }
  0x56   : > { %s759_s5 = sshll.u32 %s1212_s18, 3  ;;  %s165_s6 = scalar_lea.sflag [#allocation6], %s1212_s18 }
  0x57   : > { %s168_s3 = scalar_lea.vmem [#allocation5], %s759_s5 }
  0x58   : > { %1006 = dma.done.wait (%p1303_p11), %s165_s6, 128  }
  0x59   : > { %1008 = vsyncadd (%p1303_p11), %s165_s6, 4294967168  ;;  %v1039_v0 = vmov 0.0   ;;  %vm1040_vm0 = vmmov 0   ;;  %vm191_vm1 = vcmask 64512   ;;  %v190_v1 = vld [vmem:[%s168_s3] sm:$0xff]  ;;  %v189_v2 = vld [vmem:[#allocation2] sm:$0xff] }
  0x5a   : > { %792 = vmatprep.subr.mxu0 %v1039_v0  ;;  %794 = vmatprep.mubr.msk.f32.mxu0 %vm1040_vm0, %v1039_v0  ;;  %v196_v3 = vand.u32 4294901760, %v190_v1  ;;  %v193_v4 = vsel %vm191_vm1, %v189_v2, 0  ;;  %s762_s17 = sshll.u32 %s1027_s12, 7  ;;  %s188_s19 = scalar_lea.vmem [#allocation7], %s759_s5  ;;  %vm641_vm2 = vcmask 261120  }
  0x5b   : > { %777 = vmatprep.subr.mxu1 %v1039_v0  ;;  %779 = vmatprep.mubr.msk.f32.mxu1 %vm1040_vm0, %v1039_v0  ;;  %v261_v5 = vand.u32 4294901760, %v193_v4  ;;  %s658_s21 = sshll.u32 %s188_s19, 4  ;;  %s1234_s7 = scalar_lea.hbm %s1285_s2, %s762_s17  ;;  %s1236_s21 = int_to_ptr.vmem [resolvable:$true] %s658_s21 }
  0x5c   : > { %v273_v6 = vsub.f32 %v190_v1, %v196_v3  ;;  %793 = vmatpush3.msra.mxu0 %v196_v3  ;;  %778 = vmatpush3.msra.mxu1 %v196_v3  ;;  %s644_s8 = scalar_lea.sflag [#allocation4], %s1212_s18  ;;  %s949_s12 = scalar_lea.vmem %s1236_s21, 128 }
  0x5d   : > { %v262_v7 = vsub.f32 %v193_v4, %v261_v5  ;;  %782 = vmatprep.subr.mxu1 %v1039_v0  ;;  %797 = vmatprep.subr.mxu0 %v1039_v0  ;;  %p950_p4 = scmp.ne.s32.totalorder %s1236_s21, %s949_s12  ;;  %s1041_s15 = smov [#allocation7]  }
  0x5e   : > { %v274_v8 = vand.u32 4294901760, %v273_v6  ;;  %s953_s16 = sshll.u32 %s1041_s15, 4  ;;  %s954_s16 = int_to_ptr.vmem [resolvable:$false] %s953_s16 }
  0x5f   : > { %v263_v9 = vand.u32 4294901760, %v262_v7  ;;  %p951_p6 = pnand %p950_p4, %p1158_p13  ;;  %s955_s23 = scalar_lea.vmem %s954_s16, 256 }
  0x60   : > { %v275_v10 = vsub.f32 %v273_v6, %v274_v8  ;;  %p956_p9 = scmp.lt.s32.totalorder %s1236_s21, %s954_s16  ;;  %p957_p12 = scmp.lt.s32.totalorder %s955_s23, %s949_s12 }
  0x61   : > { %795 = vmatmul.mubr.f32.vlgmr.msra.gmra.mrb[0].mxu0 %v263_v9  ;;  %v264_v11 = vsub.f32 %v262_v7, %v263_v9  ;;  %p952_p8 = pneg %p951_p6 }
  0x62   : > { %v276_v12 = vand.u32 4294901760, %v275_v10  ;;  %798 = vmatpush3.msra.mxu0 %v274_v8  ;;  %799 = vmatprep.mubr.msk.f32.mxu0 %vm1040_vm0, %v1039_v0  ;;  %p958_p0 = por %p957_p12, %p956_p9 }
  0x63   : > { %v265_v13 = vand.u32 4294901760, %v264_v11  ;;  %802 = vmatprep.subr.mxu0 %v1039_v0 }
  0x64   : > { %p959_p5 = pnand %p958_p0, %p952_p8 }
  0x65   : > { %780 = vmatmul.mubr.f32.vlgmr.msra.gmra.mrb[0].mxu1 %v265_v13 }
  0x66   : > { %783 = vmatpush3.msra.mxu1 %v276_v12  ;;  %784 = vmatprep.mubr.msk.f32.mxu1 %vm1040_vm0, %v1039_v0 }
  0x67   : > { %787 = vmatprep.subr.mxu1 %v1039_v0 }
  0x69   : > { %800 = vmatmul.mubr.f32.vlgmr.msra.gmra.mrb[0].mxu0 %v261_v5 }
  0x6a   : > { %803 = vmatpush3.msra.mxu0 %v196_v3  ;;  %804 = vmatprep.mubr.msk.f32.mxu0 %vm1040_vm0, %v1039_v0 }
  0x6d   : > { %785 = vmatmul.mubr.f32.vlgmr.msra.gmra.mrb[0].mxu1 %v261_v5 }
  0x6e   : > { %788 = vmatpush3.msra.mxu1 %v273_v6  ;;  %789 = vmatprep.mubr.msk.f32.mxu1 %vm1040_vm0, %v1039_v0 }
  0x71   : > { %805 = vmatmul.mubr.f32.vlgmr.msra.gmra.mrb[0].mxu0 %v261_v5 }
  0x75   : > { %790 = vmatmul.mubr.f32.vlgmr.msra.gmra.mrb[0].mxu1 %v262_v7 }
 0x144   : > { %v637_v14 = vpop.f32.mrb[0].mxu0 }
 0x145   : > { %v806_v15 = vpop.f32.mrb[1].mxu0 }
 0x148   : > { %v417_v16 = vpop.f32.mrb[0].mxu1 }
 0x149   : > { %v807_v17 = vadd.f32 %v637_v14, %v417_v16  ;;  %v791_v18 = vpop.f32.mrb[1].mxu1 }
 0x14b   : > { %642 = vst.msk [vmem:[%s188_s19] sm:$0xff] %vm641_vm2, %v807_v17 }
 0x14c   : > { %962 = shalt.err (!%p959_p5)
}
 0x14d   : > { %s963_s24 = scalar_lea.hbm %s1234_s7, 128  ;;  %s967_s30 = scalar_lea.hbm %s1285_s2, 256 }
 0x14e   : > { %p964_p10 = scmp.ne.s32.totalorder %s1234_s7, %s963_s24  ;;  %p968_p7 = scmp.lt.u32.totalorder %s1234_s7, %s1285_s2 }
 0x14f   : > { %p969_p3 = scmp.lt.u32.totalorder %s967_s30, %s963_s24  ;;  %p971_p4 = scmp.lt.u32.totalorder %s963_s24, %s1234_s7 }
 0x150   : > { %p965_p1 = pnand %p964_p10, %p1158_p13 }
 0x151   : > { %p970_p11 = por %p969_p3, %p968_p7 }
 0x152   : > { %p966_p2 = pneg %p965_p1 }
 0x153   : > { %p972_p6 = por %p971_p4, %p970_p11 }
 0x155   : > { %p973_p8 = pnand %p972_p6, %p966_p2 }
 0x157   : > { %976 = shalt.err (!%p973_p8)
}
 0x158   : > { %822 = dma.vmem_to_hbm [thread:$0]  (%p1158_p13), %s1236_s21, 128, %s1234_s7, %s644_s8  }
 0x159 PF: > { %s670_s6 = sand.u32 1, %s1015_s9   ;;  %p1304_p9 = scmp.ne.s32.totalorder %s1293_s20, 0 }
 0x15a   : > { %p1305_p12 = scmp.ge.s32.totalorder %s1035_s14, 2  ;;  %s671_s3 = scalar_lea.sflag [#allocation4], %s670_s6 }
 0x15c   : > { %p833_p0 = pnand %p1305_p12, %p1304_p9 }
 0x15e   : > { %1010 = dma.done.wait (!%p833_p0), %s671_s3, 128  }
 0x15f   : > { %1012 = vsyncadd (!%p833_p0), %s671_s3, 4294967168  ;;  %s19_s14 = sadd.s32 1, %s1035_s14   ;;  %s1306_s9 = smov %s1019_s10 }
 0x160   : > { %p16_p5 = scmp.ge.s32.totalorder %s19_s14, 4   ;;  %s1307_s10 = smov %s1023_s11 }
 0x161   : > { %s1308_s11 = smov %s1166_s28  ;;  %s1309_s12 = smov %s1031_s13 }
 0x162   : > { %s1310_s13 = smov %s1312_s25  ;;  %18 = sbr.rel (!%p16_p5) target bundleno = 7 (0x7), region = 78 }
 0x169   :  { %676 = vsyncpa [#allocation3], 1 }
 0x16a   :  { %678 = vsyncpa [#allocation3 + $0x1], 1 }
 0x16b   :  { %679 = vsyncpa [#allocation6], 1 }
 0x16c   :  { %681 = vsyncpa [#allocation6 + $0x1], 1 }
 0x16d   :  { %682 = vsyncpa [#allocation4], 1 }
 0x16e   :  { %684 = vsyncpa [#allocation4 + $0x1], 1 }

</bundles_post_ra>
